<compile_context>
chip_gen: v7x
topology: tpu7x:2x2x1
jax: 0.10.0
libtpu: 0.0.40
codegen_flags: <defaults>
</compile_context>

<pallas_src>
import jax
import jax.numpy as jnp
from jax.experimental import pallas as pl
from jax.experimental.pallas import tpu as pltpu


def pcnn_one_kernel(epos_ref, emb_ref, wconv_ref, bconv_ref, wlin_ref, blin_ref,
                    out_ref):
    """TB sentences per step: conv -> piecewise max pool -> tanh -> fused linear."""
    TB, Lp, D = emb_ref.shape
    K, _, Fp = wconv_ref.shape
    L = Lp - K + 1  # conv output length

    # 1) 1-D conv over the sequence == sum of K shifted (TB*L, D) @ (D, Fp) matmuls.
    #    bf16 operands, f32 accumulation on the MXU. The shifted slice stays inside
    #    each item's padded window, so it never crosses batch boundaries.
    conv = jnp.zeros((TB * L, Fp), jnp.float32)
    for k in range(K):  # K is small and static
        xk = emb_ref[:, k:k + L, :].reshape(TB * L, D)
        conv = conv + jnp.dot(xk, wconv_ref[k], preferred_element_type=jnp.float32)
    conv = conv.reshape(TB, L, Fp)

    # 2) Piecewise max pooling over the 3 segments split by per-item entity positions.
    epos = epos_ref[...]                                            # (TB, 2) int32
    idx = jax.lax.broadcasted_iota(jnp.int32, (TB, L, 1), 1)
    p1 = jax.lax.broadcast_in_dim(epos[:, 0:1], (TB, L, 1), (0, 2))
    p2 = jax.lax.broadcast_in_dim(epos[:, 1:2], (TB, L, 1), (0, 2))
    masks = (idx < p1, (idx >= p1) & (idx < p2), idx >= p2)

    neg = jnp.float32(-1e30)
    bconv = bconv_ref[...]                                          # (1, Fp) f32
    feats = []
    for j in range(3):
        pooled = jnp.max(jnp.where(masks[j], conv, neg), axis=1)    # (TB, Fp)
        # bias after the max: max(conv + b) == max(conv) + b (exact rewrite).
        feats.append(jnp.tanh(pooled + bconv))
    feat = jnp.concatenate(feats, axis=1)                           # (TB, 3*Fp)

    # 3) Fused linear: single (TB, 3*Fp) @ (3*Fp, Cp) matmul + bias (f32 path).
    out = jnp.dot(feat, wlin_ref[...], preferred_element_type=jnp.float32)
    out_ref[...] = (out + blin_ref[...]).astype(out_ref.dtype)


def pcnn_one_forward(emb_padded, entity_pos, w_conv, b_conv, w_lin, b_lin,
                     *, tile_b=128):
    """emb_padded: [B, L+K-1, D] f32; entity_pos: [B, 2] int; w_conv: [K, D, F];
    b_conv: [1, F]; w_lin: [3, F, C] with w_lin[j, f, c] == torch.weight[c, f*3+j];
    b_lin: [1, C]. Returns [B, C] f32 logits (eval-mode, no dropout)."""
    B, Lp, D = emb_padded.shape
    K, _, F = w_conv.shape
    C = w_lin.shape[2]

    # Lane padding of filters / classes (exact: padded weights are zero, so padded
    # features contribute tanh(0) * 0 = 0 and padded classes are sliced off).
    F_pad = ((F + 127) // 128) * 128
    C_pad = ((C + 127) // 128) * 128

    # Batch tile: multiple of 8 sublanes; keep >= 2 grid steps for large B so the
    # "parallel" grid axis can shard across both TensorCores on v7x.
    TB = max(8, (min(tile_b, ((B + 7) // 8) * 8) // 8) * 8)
    B_pad = ((B + TB - 1) // TB) * TB

    # Parameter prep (zero padding is exact; bf16 only on the matmul inputs).
    w_conv_p = jnp.zeros((K, D, F_pad), jnp.bfloat16)
    w_conv_p = w_conv_p.at[:, :, :F].set(w_conv.astype(jnp.bfloat16))
    b_conv_p = jnp.zeros((1, F_pad), jnp.float32).at[:, :F].set(b_conv)
    w_lin_p = jnp.zeros((3, F_pad, C_pad), jnp.float32).at[:, :F, :C].set(w_lin)
    w_lin_flat = w_lin_p.reshape(3 * F_pad, C_pad)        # piece-major flatten
    b_lin_p = jnp.zeros((1, C_pad), jnp.float32).at[:, :C].set(b_lin)

    emb_p = jnp.zeros((B_pad, Lp, D), jnp.bfloat16)
    emb_p = emb_p.at[:B].set(emb_padded.astype(jnp.bfloat16))
    epos_p = jnp.zeros((B_pad, 2), jnp.int32).at[:B].set(entity_pos.astype(jnp.int32))

    out = pl.pallas_call(
        pcnn_one_kernel,
        out_shape=jax.ShapeDtypeStruct((B_pad, C_pad), jnp.float32),
        grid_spec=pltpu.PrefetchScalarGridSpec(
            num_scalar_prefetch=0,
            grid=(B_pad // TB,),
            in_specs=[
                pl.BlockSpec((TB, 2), lambda i: (i, 0)),            # entity positions
                pl.BlockSpec((TB, Lp, D), lambda i: (i, 0, 0)),     # bf16 embeddings
                pl.BlockSpec((K, D, F_pad), lambda i: (0, 0, 0)),   # conv weight
                pl.BlockSpec((1, F_pad), lambda i: (0, 0)),         # conv bias
                pl.BlockSpec((3 * F_pad, C_pad), lambda i: (0, 0)),  # fused linear W
                pl.BlockSpec((1, C_pad), lambda i: (0, 0)),         # linear bias
            ],
            out_specs=pl.BlockSpec((TB, C_pad), lambda i: (i, 0)),  # lane-dense store
        ),
        compiler_params=pltpu.CompilerParams(
            dimension_semantics=("parallel",)),
        # NOTE: for very large TB * Lp * D, raise vmem_limit_bytes here.
    )(epos_p, emb_p, w_conv_p, b_conv_p, w_lin_flat, b_lin_p)

    return out[:B, :C]


if __name__ == "__main__":
    key = jax.random.PRNGKey(0)

    # Small shapes consistent with the module.
    B, L = 2, 8                  # batch, sentence length
    word_vocab, pos_vocab = 50, 20
    word_dim, pos_dim = 16, 8
    D = word_dim + 2 * pos_dim   # 32: word + two position embeddings concatenated
    F = 32                       # filters
    K = 3                        # kernel_size (over the sequence axis)
    pad = 1                      # "same" padding for K=3
    C = 4                        # class_num

    keys = jax.random.split(key, 10)

    # Embedding tables (deterministic synthetic).
    word_emb_mat = 0.1 * jax.random.normal(keys[0], (word_vocab, word_dim), jnp.float32)
    pos1_emb_mat = 0.1 * jax.random.normal(keys[1], (pos_vocab, pos_dim), jnp.float32)
    pos2_emb_mat = 0.1 * jax.random.normal(keys[2], (pos_vocab, pos_dim), jnp.float32)

    # Inputs (LongTensor-equivalents).
    sentence = jax.random.randint(keys[3], (B, L), 0, word_vocab)
    position1 = jax.random.randint(keys[4], (B, L), 0, pos_vocab)
    position2 = jax.random.randint(keys[5], (B, L), 0, pos_vocab)
    entity_pos = jnp.array([[2, 5], [3, 6]], dtype=jnp.int32)   # non-empty segments

    # Parameters: xavier-uniform weights, zero biases (per init_params()).
    limit_c = (6.0 / (K * D + F)) ** 0.5
    w_conv = jax.random.uniform(keys[6], (K, D, F), jnp.float32, -limit_c, limit_c)
    b_conv = jnp.zeros((1, F), jnp.float32)
    limit_l = (6.0 / (3 * F + C)) ** 0.5
    w_lin = jax.random.uniform(keys[7], (3, F, C), jnp.float32, -limit_l, limit_l)
    b_lin = jnp.zeros((1, C), jnp.float32)

    # Glue (plain JAX): embedding gathers, concat, sequence zero-padding.
    emb = jnp.concatenate([word_emb_mat[sentence],
                           pos1_emb_mat[position1],
                           pos2_emb_mat[position2]], axis=-1)        # [B, L, D]
    emb_padded = jnp.pad(emb, ((0, 0), (pad, pad), (0, 0)))          # [B, L+2, D]

    out = pcnn_one_forward(emb_padded, entity_pos, w_conv, b_conv, w_lin, b_lin)
    out = jax.block_until_ready(out)

    # Pure-JAX reference. The kernel feeds the conv matmul with bf16 embeddings/weights
    # (f32 accumulation), so the reference uses the same bf16-rounded inputs; everything
    # downstream (bias, max, tanh, linear) is f32 exactly like the module.
    def ref_forward():
        embf = emb_padded.astype(jnp.bfloat16).astype(jnp.float32)
        wcf = w_conv.astype(jnp.bfloat16).astype(jnp.float32)
        conv = sum(jnp.einsum("blp,pf->blf", embf[:, k:k + L, :], wcf[k],
                              precision=jax.lax.Precision.HIGHEST)
                   for k in range(K)) + b_conv[None]
        idx = jnp.arange(L)[None, :, None]
        p1 = entity_pos[:, 0][:, None, None]
        p2 = entity_pos[:, 1][:, None, None]
        masks = [idx < p1, (idx >= p1) & (idx < p2), idx >= p2]
        res = jnp.zeros((B, C), jnp.float32)
        for j in range(3):
            pooled = jnp.max(jnp.where(masks[j], conv, -1e30), axis=1)   # [B, F]
            res = res + jnp.dot(jnp.tanh(pooled), w_lin[j],
                                precision=jax.lax.Precision.HIGHEST)
        return res + b_lin

    ref = ref_forward()
    assert out.shape == (B, C)
    assert jnp.allclose(out, ref, atol=1e-3, rtol=1e-3), (out, ref)
    print("KERNEL_OK")
</pallas_src>

<mosaic_0001>
module attributes {stable_mosaic.version = 11 : i64} {
  func.func @pcnn_one_kernel(%arg0: i32, %arg1: memref<8x2xi32, #tpu.memory_space<vmem>>, %arg2: memref<8x10x32xbf16, #tpu.memory_space<vmem>>, %arg3: memref<3x32x128xbf16, #tpu.memory_space<vmem>>, %arg4: memref<1x128xf32, #tpu.memory_space<vmem>>, %arg5: memref<384x128xf32, #tpu.memory_space<vmem>>, %arg6: memref<1x128xf32, #tpu.memory_space<vmem>>, %arg7: memref<8x128xf32, #tpu.memory_space<vmem>>) attributes {dimension_semantics = [#tpu.dimension_semantics<parallel>], iteration_bounds = array<i64: 1>, scalar_prefetch = 0 : i64, scratch_operands = 0 : i64, tpu.core_type = #tpu.core_type<tc>, window_params = [{transform_indices = @transform_0, window_bounds = array<i64: 8, 2>}, {transform_indices = @transform_1, window_bounds = array<i64: 8, 10, 32>}, {pipeline_mode = #tpu.pipeline_mode<synchronous>, transform_indices = @transform_2, window_bounds = array<i64: 3, 32, 128>}, {pipeline_mode = #tpu.pipeline_mode<synchronous>, transform_indices = @transform_3, window_bounds = array<i64: 1, 128>}, {pipeline_mode = #tpu.pipeline_mode<synchronous>, transform_indices = @transform_4, window_bounds = array<i64: 384, 128>}, {pipeline_mode = #tpu.pipeline_mode<synchronous>, transform_indices = @transform_5, window_bounds = array<i64: 1, 128>}, {transform_indices = @transform_6, window_bounds = array<i64: 8, 128>}]} {
    %cst = arith.constant 0.000000e+00 : f32
    %0 = vector.broadcast %cst : f32 to vector<64x128xf32>
    %c0 = arith.constant 0 : index
    %c0_0 = arith.constant 0 : index
    %c0_1 = arith.constant 0 : index
    %1 = vector.load %arg2[%c0, %c0_0, %c0_1] : memref<8x10x32xbf16, #tpu.memory_space<vmem>>, vector<8x8x32xbf16>
    %2 = vector.shape_cast %1 : vector<8x8x32xbf16> to vector<64x32xbf16>
    %c0_2 = arith.constant 0 : index
    %c0_3 = arith.constant 0 : index
    %c0_4 = arith.constant 0 : index
    %3 = vector.load %arg3[%c0_2, %c0_3, %c0_4] : memref<3x32x128xbf16, #tpu.memory_space<vmem>>, vector<1x32x128xbf16>
    %4 = vector.shape_cast %3 : vector<1x32x128xbf16> to vector<32x128xbf16>
    %cst_5 = arith.constant dense<0.000000e+00> : vector<64x128xf32>
    %5 = tpu.matmul %2, %4, %cst_5 {dimension_numbers = #tpu.dot_dimension_numbers<[1], [0], [0], [1], [0, 0, 1, 1], [], []>} : vector<64x32xbf16>, vector<32x128xbf16>, vector<64x128xf32> -> vector<64x128xf32>
    %6 = arith.addf %0, %5 : vector<64x128xf32>
    %c0_6 = arith.constant 0 : index
    %c1 = arith.constant 1 : index
    %c0_7 = arith.constant 0 : index
    %7 = vector.load %arg2[%c0_6, %c1, %c0_7] : memref<8x10x32xbf16, #tpu.memory_space<vmem>>, vector<8x8x32xbf16>
    %8 = vector.shape_cast %7 : vector<8x8x32xbf16> to vector<64x32xbf16>
    %c1_8 = arith.constant 1 : index
    %c0_9 = arith.constant 0 : index
    %c0_10 = arith.constant 0 : index
    %9 = vector.load %arg3[%c1_8, %c0_9, %c0_10] : memref<3x32x128xbf16, #tpu.memory_space<vmem>>, vector<1x32x128xbf16>
    %10 = vector.shape_cast %9 : vector<1x32x128xbf16> to vector<32x128xbf16>
    %cst_11 = arith.constant dense<0.000000e+00> : vector<64x128xf32>
    %11 = tpu.matmul %8, %10, %cst_11 {dimension_numbers = #tpu.dot_dimension_numbers<[1], [0], [0], [1], [0, 0, 1, 1], [], []>} : vector<64x32xbf16>, vector<32x128xbf16>, vector<64x128xf32> -> vector<64x128xf32>
    %12 = arith.addf %6, %11 : vector<64x128xf32>
    %c0_12 = arith.constant 0 : index
    %c2 = arith.constant 2 : index
    %c0_13 = arith.constant 0 : index
    %13 = vector.load %arg2[%c0_12, %c2, %c0_13] : memref<8x10x32xbf16, #tpu.memory_space<vmem>>, vector<8x8x32xbf16>
    %14 = vector.shape_cast %13 : vector<8x8x32xbf16> to vector<64x32xbf16>
    %c2_14 = arith.constant 2 : index
    %c0_15 = arith.constant 0 : index
    %c0_16 = arith.constant 0 : index
    %15 = vector.load %arg3[%c2_14, %c0_15, %c0_16] : memref<3x32x128xbf16, #tpu.memory_space<vmem>>, vector<1x32x128xbf16>
    %16 = vector.shape_cast %15 : vector<1x32x128xbf16> to vector<32x128xbf16>
    %cst_17 = arith.constant dense<0.000000e+00> : vector<64x128xf32>
    %17 = tpu.matmul %14, %16, %cst_17 {dimension_numbers = #tpu.dot_dimension_numbers<[1], [0], [0], [1], [0, 0, 1, 1], [], []>} : vector<64x32xbf16>, vector<32x128xbf16>, vector<64x128xf32> -> vector<64x128xf32>
    %18 = arith.addf %12, %17 : vector<64x128xf32>
    %19 = vector.shape_cast %18 : vector<64x128xf32> to vector<8x8x128xf32>
    %c0_18 = arith.constant 0 : index
    %c0_19 = arith.constant 0 : index
    %20 = vector.load %arg1[%c0_18, %c0_19] : memref<8x2xi32, #tpu.memory_space<vmem>>, vector<8x2xi32>
    %21 = tpu.iota {dimensions = array<i32: 1>} : vector<8x8x1xi32>
    %22 = vector.extract_strided_slice %20 {offsets = [0, 0], sizes = [8, 1], strides = [1, 1]} : vector<8x2xi32> to vector<8x1xi32>
    %23 = vector.shape_cast %22 : vector<8x1xi32> to vector<8x1x1xi32>
    %24 = vector.broadcast %23 : vector<8x1x1xi32> to vector<8x8x1xi32>
    %25 = vector.extract_strided_slice %20 {offsets = [0, 1], sizes = [8, 1], strides = [1, 1]} : vector<8x2xi32> to vector<8x1xi32>
    %26 = vector.shape_cast %25 : vector<8x1xi32> to vector<8x1x1xi32>
    %27 = vector.broadcast %26 : vector<8x1x1xi32> to vector<8x8x1xi32>
    %28 = arith.cmpi slt, %21, %24 : vector<8x8x1xi32>
    %29 = arith.cmpi sge, %21, %24 : vector<8x8x1xi32>
    %30 = arith.cmpi slt, %21, %27 : vector<8x8x1xi32>
    %31 = arith.andi %29, %30 : vector<8x8x1xi1>
    %32 = arith.cmpi sge, %21, %27 : vector<8x8x1xi32>
    %c0_20 = arith.constant 0 : index
    %c0_21 = arith.constant 0 : index
    %33 = vector.load %arg4[%c0_20, %c0_21] : memref<1x128xf32, #tpu.memory_space<vmem>>, vector<1x128xf32>
    %cst_22 = arith.constant -1.000000e+30 : f32
    %34 = vector.shape_cast %28 : vector<8x8x1xi1> to vector<8x8x1xi1>
    %35 = vector.broadcast %34 : vector<8x8x1xi1> to vector<8x8x128xi1>
    %36 = vector.broadcast %cst_22 : f32 to vector<8x8x128xf32>
    %37 = arith.select %35, %19, %36 : vector<8x8x128xi1>, vector<8x8x128xf32>
    %cst_23 = arith.constant dense<0xFF800000> : vector<8x128xf32>
    %38 = vector.multi_reduction <maximumf>, %37, %cst_23 [1] : vector<8x8x128xf32> to vector<8x128xf32>
    %39 = vector.broadcast %33 : vector<1x128xf32> to vector<8x128xf32>
    %40 = arith.addf %38, %39 : vector<8x128xf32>
    %41 = math.tanh %40 : vector<8x128xf32>
    %cst_24 = arith.constant -1.000000e+30 : f32
    %42 = vector.shape_cast %31 : vector<8x8x1xi1> to vector<8x8x1xi1>
    %43 = vector.broadcast %42 : vector<8x8x1xi1> to vector<8x8x128xi1>
    %44 = vector.broadcast %cst_24 : f32 to vector<8x8x128xf32>
    %45 = arith.select %43, %19, %44 : vector<8x8x128xi1>, vector<8x8x128xf32>
    %cst_25 = arith.constant dense<0xFF800000> : vector<8x128xf32>
    %46 = vector.multi_reduction <maximumf>, %45, %cst_25 [1] : vector<8x8x128xf32> to vector<8x128xf32>
    %47 = vector.broadcast %33 : vector<1x128xf32> to vector<8x128xf32>
    %48 = arith.addf %46, %47 : vector<8x128xf32>
    %49 = math.tanh %48 : vector<8x128xf32>
    %cst_26 = arith.constant -1.000000e+30 : f32
    %50 = vector.shape_cast %32 : vector<8x8x1xi1> to vector<8x8x1xi1>
    %51 = vector.broadcast %50 : vector<8x8x1xi1> to vector<8x8x128xi1>
    %52 = vector.broadcast %cst_26 : f32 to vector<8x8x128xf32>
    %53 = arith.select %51, %19, %52 : vector<8x8x128xi1>, vector<8x8x128xf32>
    %cst_27 = arith.constant dense<0xFF800000> : vector<8x128xf32>
    %54 = vector.multi_reduction <maximumf>, %53, %cst_27 [1] : vector<8x8x128xf32> to vector<8x128xf32>
    %55 = vector.broadcast %33 : vector<1x128xf32> to vector<8x128xf32>
    %56 = arith.addf %54, %55 : vector<8x128xf32>
    %57 = math.tanh %56 : vector<8x128xf32>
    %58 = tpu.concatenate %41, %49, %57 in 1 : vector<8x128xf32>, vector<8x128xf32>, vector<8x128xf32> -> vector<8x384xf32>
    %c0_28 = arith.constant 0 : index
    %c0_29 = arith.constant 0 : index
    %59 = vector.load %arg5[%c0_28, %c0_29] : memref<384x128xf32, #tpu.memory_space<vmem>>, vector<384x128xf32>
    %cst_30 = arith.constant dense<0.000000e+00> : vector<8x128xf32>
    %60 = tpu.matmul %58, %59, %cst_30 {dimension_numbers = #tpu.dot_dimension_numbers<[1], [0], [0], [1], [0, 0, 1, 1], [], []>} : vector<8x384xf32>, vector<384x128xf32>, vector<8x128xf32> -> vector<8x128xf32>
    %c0_31 = arith.constant 0 : index
    %c0_32 = arith.constant 0 : index
    %61 = vector.load %arg6[%c0_31, %c0_32] : memref<1x128xf32, #tpu.memory_space<vmem>>, vector<1x128xf32>
    %62 = vector.broadcast %61 : vector<1x128xf32> to vector<8x128xf32>
    %63 = arith.addf %60, %62 : vector<8x128xf32>
    %c0_33 = arith.constant 0 : index
    %c0_34 = arith.constant 0 : index
    %64 = vector.load %arg7[%c0_33, %c0_34] : memref<8x128xf32, #tpu.memory_space<vmem>>, vector<8x128xf32>
    tpu.vector_store %arg7[%c0_33, %c0_34], %63 {strides = array<i32>} : memref<8x128xf32, #tpu.memory_space<vmem>>, vector<8x128xf32>,
    return
  }
  func.func @transform_0(%arg0: i32) -> (i32, i32) {
    %c0_i32 = arith.constant 0 : i32
    %c0_i32_0 = arith.constant 0 : i32
    return %arg0, %c0_i32 : i32, i32
  }
  func.func @transform_1(%arg0: i32) -> (i32, i32, i32) {
    %c0_i32 = arith.constant 0 : i32
    %c0_i32_0 = arith.constant 0 : i32
    %c0_i32_1 = arith.constant 0 : i32
    return %arg0, %c0_i32, %c0_i32_0 : i32, i32, i32
  }
  func.func @transform_2(%arg0: i32) -> (i32, i32, i32) {
    %c0_i32 = arith.constant 0 : i32
    %c0_i32_0 = arith.constant 0 : i32
    %c0_i32_1 = arith.constant 0 : i32
    %c0_i32_2 = arith.constant 0 : i32
    return %c0_i32, %c0_i32_0, %c0_i32_1 : i32, i32, i32
  }
  func.func @transform_3(%arg0: i32) -> (i32, i32) {
    %c0_i32 = arith.constant 0 : i32
    %c0_i32_0 = arith.constant 0 : i32
    %c0_i32_1 = arith.constant 0 : i32
    return %c0_i32, %c0_i32_0 : i32, i32
  }
  func.func @transform_4(%arg0: i32) -> (i32, i32) {
    %c0_i32 = arith.constant 0 : i32
    %c0_i32_0 = arith.constant 0 : i32
    %c0_i32_1 = arith.constant 0 : i32
    return %c0_i32, %c0_i32_0 : i32, i32
  }
  func.func @transform_5(%arg0: i32) -> (i32, i32) {
    %c0_i32 = arith.constant 0 : i32
    %c0_i32_0 = arith.constant 0 : i32
    %c0_i32_1 = arith.constant 0 : i32
    return %c0_i32, %c0_i32_0 : i32, i32
  }
  func.func @transform_6(%arg0: i32) -> (i32, i32) {
    %c0_i32 = arith.constant 0 : i32
    %c0_i32_0 = arith.constant 0 : i32
    return %arg0, %c0_i32 : i32, i32
  }
}

</mosaic_0001>

<bundles_post_ra>
// kernel: tpu_custom_call.1
= control target key start
LH: loop header
LB: loop body
LE: loop exit
PB: predicated region body
PF: predicated region fallthrough
CT: control target
= control target key end

     0   :  { %11 = vsyncpa [#allocation3], 0  ;;  %s2380_s0 = inlined_call_operand.vmem [shape: s32[8,2], index: 0, kind: input, shape index: {}]   ;;  %s2381_s1 = inlined_call_operand.vmem [shape: bf16[8,10,32], index: 1, kind: input, shape index: {}]   ;;  %s2382_s2 = inlined_call_operand.vmem [shape: bf16[3,32,128], index: 2, kind: input, shape index: {}]   ;;  %s2383_s3 = inlined_call_operand.vmem [shape: f32[1,128], index: 3, kind: input, shape index: {}]   ;;  %s2384_s4 = inlined_call_operand.hbm [shape: f32[384,128], index: 4, kind: input, shape index: {}]   ;;  %s2385_s5 = inlined_call_operand.vmem [shape: f32[1,128], index: 5, kind: input, shape index: {}]   ;;  %s2386_s6 = inlined_call_operand.hbm [shape: f32[8,128], index: 6, kind: output, shape index: {}]  }
   0x1   :  { %12 = vsyncpa [#allocation4], 0  ;;  %s1708_s21 = smov [#allocation2]   ;;  %s1660_s25 = scalar_lea.hbm %s2384_s4, 6144 }
   0x2   :  { %s26_s22 = sshll.u32 %s1708_s21, 4  ;;  %p1661_p0 = scmp.ne.s32.totalorder %s2384_s4, %s1660_s25  ;;  %s27_s22 = int_to_ptr.vmem [resolvable:$true] %s26_s22 }
   0x3   :  { %p1664_p1 = scmp.lt.u32.totalorder %s1660_s25, %s2384_s4 }
   0x5   :  { %p1666_p2 = pnand %p1664_p1, %p1661_p0 }
   0x7   :  { %1669 = shalt.err (!%p1666_p2)
}
   0x8   :  { %s1670_s30 = scalar_lea.vmem %s27_s22, 6144  ;;  %p1675_p4 = scmp.lt.s32.totalorder %s27_s22, %s27_s22 }
   0x9   :  { %p1671_p3 = scmp.ne.s32.totalorder %s27_s22, %s1670_s30  ;;  %p1676_p5 = scmp.lt.s32.totalorder %s1670_s30, %s1670_s30 }
   0xb   :  { %p1677_p6 = por %p1676_p5, %p1675_p4 }
   0xd   :  { %p1678_p7 = pnand %p1677_p6, %p1671_p3 }
   0xf   :  { %1681 = shalt.err (!%p1678_p7)
}
  0x10   :  { %s1709_s7 = smov 128   ;;  %s1710_s8 = smov 8  }
  0x11   :  { %32 = dma.hbm_to_vmem [thread:$0]  %s2384_s4, 6144, %s27_s22, [#allocation3], %s1709_s7, %s1709_s7, %s1710_s8  }
  0x12   :  { %1704 = dma.done.wait [#allocation3], 6144  }
  0x13   :  { %1705 = vsyncadd [#allocation3], 4294961152  ;;  %v564_v0 = vlaneseq  ;;  %v1711_v1 = vmov 1966171168   ;;  %v1712_v3 = vmov 0   ;;  %v1601_v7 = vld [vmem:[%s2382_s2 + $0x10] sm:$0xff]  }
  0x14   :  { %v568_v2 = vunpack.c.l.s4 %v1711_v1  ;;  %1598 = vset.pattern.permute.xlu0 %v1712_v3  ;;  %1597 = vset.pattern.permute.xlu1 %v1712_v3  ;;  %vm59_vm0 = vsmask.f32 3328  ;;  %vm60_vm1 = vsmask.f32 7440  ;;  %v1779_v8 = vld [vmem:[%s2380_s0] sm:$0xff]  ;;  %v1603_v11 = vld [vmem:[%s2382_s2 + $0x18] sm:$0xff]  }
  0x15   :  { %v1768_v4 = vshrl.u32 %v564_v0, 7  ;;  %1443 = vmatprep.subr.bf16.mxu0 %v1601_v7  ;;  %v1792_v12 = vld [vmem:[%s2381_s1] sm:$0xf]  ;;  %v1797_v13 = vld [vmem:[%s2381_s1 + $0x8] sm:$0xf]  ;;  %v566_v31 = vcombine.high %v1779_v8, %v1779_v8  ;;  %vm1852_vm3 = vmor %vm59_vm0, %vm60_vm1  ;;  %s1713_s9 = smov 127  }
  0x16   :  { %v569_v5 = vunpack.c.0.s8 %v568_v2  ;;  %1444 = vmatpush3.bf16.msra.mxu0 %v1601_v7  ;;  %v1802_v14 = vld [vmem:[%s2381_s1 + $0x4] sm:$0x1]  ;;  %v1807_v15 = vld [vmem:[%s2381_s1 + $0xc] sm:$0x1]  ;;  %v63_v16 = vshrl.u32 %v1792_v12, 16  ;;  %v66_v17 = vshll.u32 %v1792_v12, 16 }
  0x17   :  { %v1784_v10 = vsub.s32 0, %v1768_v4  ;;  %1445 = vmatprep.subr.bf16.mxu0 %v1603_v11  ;;  %v72_v20 = vshll.u32 %v1802_v14, 16  ;;  %v77_v21 = vshrl.u32 %v1797_v13, 16  ;;  %v80_v24 = vshll.u32 %v1797_v13, 16  ;;  %v1821_v26 = vld [vmem:[%s2381_s1 + $0x10] sm:$0xf] }
  0x18   :  { %v1771_v6 = vsub.s32 %v569_v5, %v1768_v4  ;;  %v65_v22 = vrot.slane %v63_v16, 4  ;;  %v68_v23 = vrot.slane %v66_v17, 5  ;;  %v86_v25 = vshll.u32 %v1807_v15, 16  ;;  %v1831_v30 = vld [vmem:[%s2381_s1 + $0x18] sm:$0xf]  ;;  %v1843_v36 = vld [vmem:[%s2382_s2] sm:$0xff]  }
  0x19   :  { %v79_v29 = vrot.slane %v77_v21, 4  ;;  %v74_v33 = vrot.slane %v72_v20, 5  ;;  %v82_v34 = vrot.slane %v80_v24, 5  ;;  %v1838_v35 = vld [vmem:[%s2381_s1 + $0x14] sm:$0x1]  ;;  %v91_v41 = vshrl.u32 %v1821_v26, 16 }
  0x1a   :  { %v573_v9 = vrot.slane %v1779_v8, %v1771_v6  ;;  %1446 = vmatpush3.bf16.msra.mxu0 %v1603_v11  ;;  %v69_v32 = vor.u32 %v68_v23, %v65_v22  ;;  %v88_v39 = vrot.slane %v86_v25, 5  ;;  %v1859_v40 = vld [vmem:[%s2381_s1 + $0x1c] sm:$0x1]  ;;  %v94_v45 = vshll.u32 %v1821_v26, 16  ;;  %v1885_v56 = vld [vmem:[%s2381_s1 + $0x20] sm:$0xf] }
  0x1b   :  { %v83_v44 = vor.u32 %v82_v34, %v79_v29  ;;  %1455 = vmatprep.subr.bf16.mxu0 %v1843_v36  ;;  %v93_v46 = vrot.slane %v91_v41, 4  ;;  %v100_v47 = vshll.u32 %v1838_v35, 16  ;;  %v105_v48 = vshrl.u32 %v1831_v30, 16  ;;  %v1892_v60 = vld [vmem:[%s2381_s1 + $0x24] sm:$0x1]  ;;  %s1718_s21 = smov [#allocation5]  }
  0x1c   :  { %v1812_v18 = vrot.slane %v573_v9, %v1771_v6  ;;  %v581_v19 = vcombine.high %v573_v9, %v573_v9  ;;  %v70_v43 = vrot.slane %v69_v32, 4  ;;  %v96_v52 = vrot.slane %v94_v45, 5  ;;  %v1899_v1 = vld [vmem:[%s2381_s1 + $0x28] sm:$0xf]  ;;  %v1923_v23 = vld [vmem:[%s2381_s1 + $0x2c] sm:$0x1] }
  0x1d   :  { %v84_v51 = vrot.slane %v83_v44, 4  ;;  %v107_v53 = vrot.slane %v105_v48, 4  ;;  %v108_v54 = vshll.u32 %v1831_v30, 16  ;;  %v114_v55 = vshll.u32 %v1859_v40, 16  ;;  %v1937_v32 = vld [vmem:[%s2381_s1 + $0x30] sm:$0xf] }
  0x1e   :  { %v1825_v27 = vrot.slane %v1812_v18, %v1784_v10  ;;  %v603_v28 = vrot.slane %v581_v19, %v1771_v6  ;;  %v75_v50 = vsel %vm1852_vm3, %v70_v43, %v74_v33  ;;  %vm203_vm5 = vcmask 261120   ;;  %v1950_v43 = vld [vmem:[%s2381_s1 + $0x38] sm:$0xf]  ;;  %v1955_v44 = vld [vmem:[%s2381_s1 + $0x34] sm:$0x1]  ;;  %v1605_v48 = vld [vmem:[%s2382_s2 + $0x8] sm:$0xff]  }
  0x1f   :  { %v89_v57 = vsel %vm1852_vm3, %v84_v51, %v88_v39  ;;  %v97_v58 = vor.u32 %v96_v52, %v93_v46  ;;  %v102_v59 = vrot.slane %v100_v47, 5  ;;  %v110_v62 = vrot.slane %v108_v54, 5  ;;  %s1316_s22 = sshll.u32 %s1718_s21, 4  ;;  %s1317_s22 = int_to_ptr.vmem [resolvable:$true] %s1316_s22 }
  0x20   :  { %vm647_vm2 = vcmp.lt.s32.totalorder %v1768_v4, %v1825_v27  ;;  %v1848_v37 = vrot.slane %v603_v28, %v1784_v10  ;;  %v1329_v61 = vcombine.low %v75_v50, %v89_v57  ;;  %v116_v63 = vrot.slane %v114_v55, 5  ;;  %s1682_s23 = scalar_lea.vmem %s1317_s22, 128  ;;  %p1687_p9 = scmp.lt.s32.totalorder %s1317_s22, %s1317_s22 }
  0x21   :  { %v1863_v42 = vsel %vm647_vm2, 1, %v1712_v3  ;;  %v611_v0 = vcombine.high %v1812_v18, %v1812_v18  ;;  %v98_v2 = vrot.slane %v97_v58, 4  ;;  %v613_v5 = vcombine.high %v603_v28, %v603_v28  ;;  %p1683_p8 = scmp.ne.s32.totalorder %s1317_s22, %s1682_s23  ;;  %p1688_p10 = scmp.lt.s32.totalorder %s1682_s23, %s1682_s23 }
  0x22   :  { %671 = vrot.lane.b32.xlu1 %v1863_v42, %s1713_s9  ;;  %vm648_vm4 = vcmp.lt.s32.totalorder %v1768_v4, %v1848_v37  ;;  %v1902_v7 = vrot.slane %v566_v31, %v1771_v6  ;;  %v119_v8 = vshrl.u32 %v1885_v56, 16  ;;  %1447 = vmatprep.mubr.msk.bf16.mxu0 %vm203_vm5, %v1329_v61  ;;  %v111_v9 = vor.u32 %v110_v62, %v107_v53  ;;  %v1971_v53 = vld [vmem:[%s2381_s1 + $0x3c] sm:$0x1] }
  0x23   :  { %v1874_v49 = vsel %vm648_vm4, 1, %v1712_v3  ;;  %v1907_v11 = vrot.slane %v611_v0, %v1784_v10  ;;  %v122_v16 = vshll.u32 %v1885_v56, 16  ;;  %v128_v17 = vshll.u32 %v1892_v60, 16  ;;  %p1689_p11 = por %p1688_p10, %p1687_p9 }
  0x24   :  { %673 = vrot.lane.b32.xlu0 %v1874_v49, %s1713_s9  ;;  %v103_v18 = vsel %vm1852_vm3, %v98_v2, %v102_v59  ;;  %v1914_v19 = vrot.slane %v613_v5, %v1784_v10  ;;  %v596_v20 = vrot.slane %v1902_v7, %v1771_v6  ;;  %v121_v21 = vrot.slane %v119_v8, 4 }
  0x25   :  { %v112_v22 = vrot.slane %v111_v9, 4  ;;  %vm649_vm6 = vcmp.lt.s32.totalorder %v1768_v4, %v1907_v11  ;;  %v124_v24 = vrot.slane %v122_v16, 5  ;;  %v130_v25 = vrot.slane %v128_v17, 5  ;;  %v1609_v9 = vld [vmem:[%s2382_s2 + $0x20] sm:$0xff]   ;;  %p1690_p12 = pnand %p1689_p11, %p1683_p8 }
  0x26   :  { %v1926_v28 = vsel %vm649_vm6, 1, %v1712_v3  ;;  %vm650_vm7 = vcmp.lt.s32.totalorder %v1768_v4, %v1914_v19  ;;  %v1931_v29 = vrot.slane %v596_v20, %v1784_v10  ;;  %v133_v31 = vshrl.u32 %v1899_v1, 16 }
  0x27   :  { %v117_v33 = vsel %vm1852_vm3, %v112_v22, %v116_v63  ;;  %v1944_v34 = vsel %vm650_vm7, 1, %v1712_v3  ;;  %v125_v39 = vor.u32 %v124_v24, %v121_v21  ;;  %v136_v41 = vshll.u32 %v1899_v1, 16 }
  0x28   :  { %675 = vrot.lane.b32.xlu0 %v1926_v28, %s1713_s9  ;;  %v1330_v45 = vcombine.low %v103_v18, %v117_v33  ;;  %677 = vrot.lane.b32.xlu1 %v1944_v34, %s1713_s9  ;;  %vm651_vm8 = vcmp.lt.s32.totalorder %v1768_v4, %v1931_v29  ;;  %v135_v46 = vrot.slane %v133_v31, 4  ;;  %v142_v47 = vshll.u32 %v1923_v23, 16 }
  0x29   :  { %v1966_v50 = vsel %vm651_vm8, 1, %v1712_v3  ;;  %v126_v51 = vrot.slane %v125_v39, 4  ;;  %v138_v52 = vrot.slane %v136_v41, 5  ;;  %v147_v54 = vshrl.u32 %v1937_v32, 16 }
  0x2a   :  { %1448 = vmatmul.mubr.msk.bf16.vlgmr.msra.gmra.mrb[0].mxu0 %vm203_vm5, %v1330_v45  ;;  %v150_v55 = vshll.u32 %v1937_v32, 16  ;;  %v156_v57 = vshll.u32 %v1955_v44, 16  ;;  %v161_v58 = vshrl.u32 %v1950_v43, 16  ;;  %v144_v61 = vrot.slane %v142_v47, 5 }
  0x2b   :  { %v139_v59 = vor.u32 %v138_v52, %v135_v46  ;;  %v149_v62 = vrot.slane %v147_v54, 4  ;;  %v164_v63 = vshll.u32 %v1950_v43, 16  ;;  %1456 = vmatpush3.bf16.msra.mxu0 %v1843_v36  ;;  %v131_v0 = vsel %vm1852_vm3, %v126_v51, %v130_v25 }
  0x2c   :  { %679 = vrot.lane.b32.xlu0 %v1966_v50, %s1713_s9  ;;  %v152_v2 = vrot.slane %v150_v55, 5  ;;  %v163_v5 = vrot.slane %v161_v58, 4  ;;  %v170_v8 = vshll.u32 %v1971_v53, 16  ;;  %1457 = vmatprep.subr.bf16.mxu0 %v1605_v48  ;;  %v582_v18 = vcombine.high %v1902_v7, %v1902_v7 }
  0x2d   :  { %v140_v16 = vrot.slane %v139_v59, 4  ;;  %v166_v17 = vrot.slane %v164_v63, 5  ;;  %v612_v21 = vcombine.high %v596_v20, %v596_v20  ;;  %v158_v36 = vrot.slane %v156_v57, 5 }
  0x2e   :  { %v153_v22 = vor.u32 %v152_v2, %v149_v62  ;;  %v172_v24 = vrot.slane %v170_v8, 5  ;;  %v610_v33 = vrot.slane %v582_v18, %v1771_v6  ;;  %v1339_v51 = vcombine.low %v1792_v12, %v1797_v13  ;;  %v391_v12 = vld [vmem:[%s2381_s1 + $0x8] sm:$0xe] }
  0x2f   :  { %v145_v25 = vsel %vm1852_vm3, %v140_v16, %v144_v61  ;;  %v167_v31 = vor.u32 %v166_v17, %v163_v5  ;;  %1458 = vmatpush3.bf16.msra.mxu0 %v1605_v48  ;;  %v1994_v39 = vrot.slane %v612_v21, %v1784_v10  ;;  %vm655_vm12 = vcmp.ge.s32.totalorder %v1768_v4, %v1825_v27  ;;  %v395_v61 = vld [vmem:[%s2381_s1 + $0x28] sm:$0xe] }
  0x30   :  { %v1331_v41 = vcombine.low %v131_v0, %v145_v25  ;;  %v154_v45 = vrot.slane %v153_v22, 4  ;;  %1467 = vmatprep.subr.bf16.mxu0 %v1609_v9  ;;  %v1997_v7 = vrot.slane %v610_v33, %v1784_v10  ;;  %v614_v20 = vcombine.high %v610_v33, %v610_v33 }
  0x31   :  { %v168_v46 = vrot.slane %v167_v31, 4  ;;  %vm653_vm9 = vcmp.lt.s32.totalorder %v1768_v4, %v1994_v39  ;;  %vm414_vm13 = vcmask 1042432   ;;  %vm656_vm14 = vcmp.ge.s32.totalorder %v1768_v4, %v1848_v37 }
  0x32   :  { %1451 = vmatprep.mubr.msk.bf16.mxu0 %vm203_vm5, %v1331_v41  ;;  %v159_v6 = vsel %vm1852_vm3, %v154_v45, %v158_v36  ;;  %v2005_v47 = vsel %vm653_vm9, 1, %v1712_v3  ;;  %vm652_vm10 = vcmp.lt.s32.totalorder %v1768_v4, %v1997_v7  ;;  %v2016_v52 = vrot.slane %v614_v20, %v1784_v10  ;;  %v390_v10 = vld [vmem:[%s2381_s1] sm:$0xe] }
  0x33   :  { %v173_v48 = vsel %vm1852_vm3, %v168_v46, %v172_v24  ;;  %683 = vrot.lane.b32.xlu0 %v2005_v47, %s1713_s9  ;;  %v668_v55 = vsel %vm652_vm10, 1, %v1712_v3  ;;  %vm657_vm15 = vcmp.ge.s32.totalorder %v1768_v4, %v1907_v11  ;;  %v1340_v13 = vcombine.low %v1821_v26, %v1831_v30  ;;  %v1611_v30 = vld [vmem:[%s2382_s2 + $0x28] sm:$0xff]  }
  0x34   :  { %v1332_v54 = vcombine.low %v159_v6, %v173_v48  ;;  %681 = vrot.lane.b32.xlu1 %v668_v55, %s1713_s9  ;;  %vm654_vm11 = vcmp.lt.s32.totalorder %v1768_v4, %v2016_v52  ;;  %vm415_vm0 = vcmask 1046532   ;;  %vm658_vm1 = vcmp.ge.s32.totalorder %v1768_v4, %v1914_v19  ;;  %v1132_v19 = vld [vmem:[#allocation2 + $0x90] sm:$0xff] }
  0x35   :  { %v2024_v38 = vsel %vm654_vm11, 1, %v1712_v3  ;;  %vm659_vm2 = vcmp.ge.s32.totalorder %v1768_v4, %v1931_v29  ;;  %v1341_v57 = vcombine.low %v1885_v56, %v1899_v1  ;;  %vm660_vm3 = vcmp.ge.s32.totalorder %v1768_v4, %v1997_v7  ;;  %vm2063_vm7 = vmor %vm414_vm13, %vm415_vm0  ;;  %v392_v1 = vld [vmem:[%s2381_s1 + $0x10] sm:$0xe]  ;;  %v1117_v7 = vld [vmem:[#allocation2 + $0x18] sm:$0xff] }
  0x36   :  { %1452 = vmatmul.mubr.msk.bf16.gmra.mrb[4].mxu0 %vm203_vm5, %v1332_v54  ;;  %vm661_vm4 = vcmp.ge.s32.totalorder %v1768_v4, %v1994_v39  ;;  %v423_v26 = vrot.slane %v1807_v15, 5  ;;  %v1349_v58 = vrot.slane %v390_v10, 9  ;;  %v1350_v59 = vrot.slane %v391_v12, 9 }
  0x37   :  { %1459 = vmatprep.mubr.msk.bf16.mxu0 %vm203_vm5, %v1339_v51  ;;  %711 = vperm.xlu0 %1598, %v1926_v28   ;;  %v419_v28 = vrot.slane %v1802_v14, 5  ;;  %vm662_vm6 = vcmp.ge.s32.totalorder %v1768_v4, %v2016_v52  ;;  %v427_v62 = vrot.slane %v1838_v35, 5  ;;  %v1342_v63 = vcombine.low %v1937_v32, %v1950_v43  ;;  %v397_v32 = vld [vmem:[%s2381_s1 + $0x38] sm:$0xe] }
  0x38   :  { %685 = vrot.lane.b32.xlu1 %v2024_v38, %s1713_s9  ;;  %v424_v56 = vsel %vm2063_vm7, %v1350_v59, %v423_v26  ;;  %v431_v0 = vrot.slane %v1859_v40, 5  ;;  %v1354_v16 = vrot.slane %v395_v61, 9  ;;  %v439_v17 = vrot.slane %v1923_v23, 5  ;;  %v1131_v59 = vld [vmem:[#allocation2 + $0x88] sm:$0xff]  ;;  %v1116_v61 = vld [vmem:[#allocation2 + $0x10] sm:$0xff] }
  0x39   :  { %v420_v15 = vsel %vm2063_vm7, %v1349_v58, %v419_v28  ;;  %v443_v22 = vrot.slane %v1955_v44, 5  ;;  %v1356_v36 = vrot.slane %v397_v32, 9  ;;  %v447_v24 = vrot.slane %v1971_v53, 5  ;;  %v1130_v58 = vld [vmem:[#allocation2 + $0x80] sm:$0xff]  ;;  %v1136_v4 = vld [vmem:[#allocation2 + $0xb0] sm:$0xff] }
  0x3a   :  { %v1361_v2 = vcombine.low %v420_v15, %v424_v56  ;;  %v440_v23 = vsel %vm2063_vm7, %v1354_v16, %v439_v17  ;;  %v928_v12 = vsel %vm657_vm15, 1, %v1712_v3  ;;  %v930_v11 = vsel %vm659_vm2, 1, %v1712_v3  ;;  %v1114_v15 = vld [vmem:[#allocation2] sm:$0xff]  ;;  %v1115_v56 = vld [vmem:[#allocation2 + $0x8] sm:$0xff]  ;;  %v1121_v16 = vld [vmem:[#allocation2 + $0x38] sm:$0xff] }
  0x3b   :  { %714 = vperm.xlu0 %1598, %v1944_v34   ;;  %v394_v34 = vld [vmem:[%s2381_s1 + $0x20] sm:$0xe]  ;;  %v448_v31 = vsel %vm2063_vm7, %v1356_v36, %v447_v24  ;;  %v932_v26 = vsel %vm661_vm4, 1, %v1712_v3  ;;  %v927_v29 = vsel %vm656_vm14, 1, %v1712_v3  ;;  %v929_v39 = vsel %vm658_vm1, 1, %v1712_v3 }
  0x3c   :  { %708 = vperm.xlu1 %1597, %v1874_v49   ;;  %v393_v49 = vld [vmem:[%s2381_s1 + $0x18] sm:$0xe]  ;;  %v1353_v8 = vrot.slane %v394_v34, 9  ;;  %v931_v37 = vsel %vm660_vm3, 1, %v1712_v3  ;;  %v1514_v14 = vpack.c.bf16 %v1131_v59, %v1130_v58  ;;  %v933_v27 = vsel %vm662_vm6, 1, %v1712_v3  ;;  %v1125_v36 = vld [vmem:[#allocation2 + $0x58] sm:$0xff] }
  0x3d   :  { %v1352_v5 = vrot.slane %v393_v49, 9  ;;  %v1133_v49 = vld [vmem:[#allocation2 + $0x98] sm:$0xff] }
  0x3e   :  { %1460 = vmatmul.mubr.msk.bf16.vlgmr.msra.gmra.mrb[0].mxu0 %vm203_vm5, %v1340_v13  ;;  %v1714_v13 = vmov 1   ;;  %1515 = vmatprep.subr.bf16.mxu1 %v1514_v14  ;;  %v1518_v34 = vpack.c.bf16 %v1133_v49, %v1132_v19 }
  0x3f   :  { %1463 = vmatprep.mubr.msk.bf16.mxu0 %vm203_vm5, %v1341_v57  ;;  %1468 = vmatpush3.bf16.msra.mxu0 %v1609_v9  ;;  %v435_v9 = vrot.slane %v1892_v60, 5  ;;  %v432_v40 = vsel %vm2063_vm7, %v1352_v5, %v431_v0  ;;  %v1135_v0 = vld [vmem:[#allocation2 + $0xa8] sm:$0xff] }
  0x40   :  { %1469 = vmatprep.subr.bf16.mxu0 %v1611_v30  ;;  %717 = vperm.xlu0 %1598, %v1966_v50   ;;  %v1351_v50 = vrot.slane %v392_v1, 9  ;;  %v1516_v1 = vpack.c.bf16 %v1115_v56, %v1114_v15  ;;  %v1119_v5 = vld [vmem:[#allocation2 + $0x28] sm:$0xff] }
  0x41   :  { %705 = vperm.xlu1 %1597, %v1863_v42   ;;  %v396_v42 = vld [vmem:[%s2381_s1 + $0x30] sm:$0xe]  ;;  %v436_v60 = vsel %vm2063_vm7, %v1353_v8, %v435_v9  ;;  %v1120_v9 = vld [vmem:[#allocation2 + $0x30] sm:$0xff] }
  0x42   :  { %v428_v35 = vsel %vm2063_vm7, %v1351_v50, %v427_v62  ;;  %v1355_v18 = vrot.slane %v396_v42, 9  ;;  %v1363_v21 = vcombine.low %v436_v60, %v440_v23  ;;  %1517 = vmatpush3.bf16.msra.mxu1 %v1516_v1  ;;  %v1520_v62 = vpack.c.bf16 %v1117_v7, %v1116_v61  ;;  %v1118_v50 = vld [vmem:[#allocation2 + $0x20] sm:$0xff]  ;;  %v1123_v23 = vld [vmem:[#allocation2 + $0x48] sm:$0xff] }
  0x43   :  { %1470 = vmatpush3.bf16.msra.mxu0 %v1611_v30  ;;  %v1362_v43 = vcombine.low %v428_v35, %v432_v40  ;;  %v926_v30 = vsel %vm655_vm12, 1, %v1712_v3  ;;  %1519 = vmatprep.subr.bf16.mxu1 %v1518_v34  ;;  %v1524_v8 = vpack.c.bf16 %v1119_v5, %v1118_v50  ;;  %v1528_v17 = vpack.c.bf16 %v1121_v16, %v1120_v9  ;;  %v1138_v35 = vld [vmem:[#allocation2 + $0xc0] sm:$0xff]  ;;  %v1139_v40 = vld [vmem:[#allocation2 + $0xc8] sm:$0xff] }
  0x44   :  { %720 = vperm.xlu0 %1598, %v668_v55   ;;  %v444_v25 = vsel %vm2063_vm7, %v1355_v18, %v443_v22  ;;  %v1530_v42 = vpack.c.bf16 %v1139_v40, %v1138_v35  ;;  %v1122_v60 = vld [vmem:[#allocation2 + $0x40] sm:$0xff]  ;;  %v1141_v18 = vld [vmem:[#allocation2 + $0xd8] sm:$0xff]  ;;  %v1124_v22 = vld [vmem:[#allocation2 + $0x50] sm:$0xff] }
  0x45   :  { %v1364_v33 = vcombine.low %v444_v25, %v448_v31  ;;  %v1532_v32 = vpack.c.bf16 %v1123_v23, %v1122_v60  ;;  %v1536_v24 = vpack.c.bf16 %v1125_v36, %v1124_v22  ;;  %v1142_v25 = vld [vmem:[#allocation2 + $0xe0] sm:$0xff]  ;;  %v1143_v31 = vld [vmem:[#allocation2 + $0xe8] sm:$0xff] }
  0x46   :  { %1464 = vmatmul.mubr.msk.bf16.gmra.mrb[4].mxu0 %vm203_vm5, %v1342_v63  ;;  %1521 = vmatpush3.bf16.msra.mxu1 %v1520_v62  ;;  %v1134_v63 = vld [vmem:[#allocation2 + $0xa0] sm:$0xff] }
  0x47   :  { %1471 = vmatprep.mubr.msk.bf16.mxu0 %vm203_vm5, %v1361_v2  ;;  %v1522_v2 = vpack.c.bf16 %v1135_v0, %v1134_v63 }
  0x49   :  { %1523 = vmatprep.subr.bf16.mxu1 %v1522_v2 }
  0x4a   :  { %1525 = vmatpush3.bf16.msra.mxu1 %v1524_v8 }
  0x4e   :  { %1472 = vmatmul.mubr.msk.bf16.vlgmr.msra.gmra.mrb[0].mxu0 %vm203_vm5, %v1362_v43  ;;  %v1140_v43 = vld [vmem:[#allocation2 + $0xd0] sm:$0xff] }
  0x4f   :  { %1475 = vmatprep.mubr.msk.bf16.mxu0 %vm203_vm5, %v1363_v21  ;;  %v1534_v21 = vpack.c.bf16 %v1141_v18, %v1140_v43 }
  0x56   :  { %1476 = vmatmul.mubr.msk.bf16.gmra.mrb[4].mxu0 %vm203_vm5, %v1364_v33  ;;  %v1538_v33 = vpack.c.bf16 %v1143_v31, %v1142_v25 }
  0x94   :  { %v672_v41 = vpop.permute.xlu1 %671 }
  0x95   :  { %vm687_vm8 = vcmp.ne.s32.totalorder %v672_v41, 0  ;;  %v1126_v41 = vld [vmem:[#allocation2 + $0x60] sm:$0xff] }
  0x96   :  { %vm695_vm9 = vmand %vm655_vm12, %vm687_vm8  ;;  %v674_v44 = vpop.permute.xlu0 %673 }
  0x97   :  { %vm688_vm10 = vcmp.ne.s32.totalorder %v674_v44, 0  ;;  %v814_v53 = vsel %vm695_vm9, 1, %v1712_v3  ;;  %v1127_v44 = vld [vmem:[#allocation2 + $0x68] sm:$0xff] }
  0x98   :  { %vm696_vm11 = vmand %vm656_vm14, %vm688_vm10  ;;  %823 = vperm.xlu1 %1597, %v814_v53   ;;  %v1540_v53 = vpack.c.bf16 %v1127_v44, %v1126_v41 }
  0x99   :  { %v815_v45 = vsel %vm696_vm11, 1, %v1712_v3 }
  0x9a   :  { %826 = vperm.xlu0 %1598, %v815_v45   ;;  %v676_v46 = vpop.permute.xlu0 %675  ;;  %v678_v20 = vpop.permute.xlu1 %677  ;;  %v1144_v45 = vld [vmem:[#allocation2 + $0xf0] sm:$0xff] }
  0x9b   :  { %vm689_vm5 = vcmp.ne.s32.totalorder %v676_v46, 0  ;;  %vm690_vm0 = vcmp.ne.s32.totalorder %v678_v20, 0  ;;  %v1145_v46 = vld [vmem:[#allocation2 + $0xf8] sm:$0xff] }
  0x9c   :  { %vm697_vm13 = vmand %vm657_vm15, %vm689_vm5  ;;  %v1542_v20 = vpack.c.bf16 %v1145_v46, %v1144_v45  ;;  %v2227_v45 = vld [vmem:[%s2383_s3] ss:$0 sm:$0xff] }
  0x9d   :  { %vm698_vm7 = vmand %vm658_vm1, %vm690_vm0  ;;  %v816_v6 = vsel %vm697_vm13, 1, %v1712_v3 }
  0x9e   :  { %v680_v48 = vpop.permute.xlu0 %679  ;;  %v817_v51 = vsel %vm698_vm7, 1, %v1712_v3  ;;  %829 = vperm.xlu1 %1597, %v816_v6   ;;  %v1128_v6 = vld [vmem:[#allocation2 + $0x70] sm:$0xff] }
  0x9f   :  { %vm691_vm8 = vcmp.ne.s32.totalorder %v680_v48, 0  ;;  %832 = vperm.xlu0 %1598, %v817_v51   ;;  %v1129_v48 = vld [vmem:[#allocation2 + $0x78] sm:$0xff] }
  0xa0   :  { %vm699_vm9 = vmand %vm659_vm2, %vm691_vm8  ;;  %v1544_v51 = vpack.c.bf16 %v1129_v48, %v1128_v6 }
  0xa1   :  { %v818_v54 = vsel %vm699_vm9, 1, %v1712_v3 }
  0xa2   :  { %835 = vperm.xlu1 %1597, %v818_v54   ;;  %v1715_v54 = vmov 0.0|0.0  }
  0xa3   :  { %723 = vperm.xlu0 %1598, %v2005_v47  }
  0xa5   :  { %v684_v55 = vpop.permute.xlu0 %683 }
  0xa6   :  { %vm693_vm10 = vcmp.ne.s32.totalorder %v684_v55, 0  ;;  %v682_v10 = vpop.permute.xlu1 %681 }
  0xa7   :  { %726 = vperm.xlu0 %1598, %v2024_v38   ;;  %vm692_vm11 = vcmp.ne.s32.totalorder %v682_v10, 0  ;;  %vm701_vm5 = vmand %vm661_vm4, %vm693_vm10 }
  0xa8   :  { %vm700_vm13 = vmand %vm660_vm3, %vm692_vm11  ;;  %v820_v28 = vsel %vm701_vm5, 1, %v1712_v3 }
  0xa9   :  { %v819_v47 = vsel %vm700_vm13, 1, %v1712_v3 }
  0xaa   :  { %838 = vperm.xlu1 %1597, %v819_v47   ;;  %v686_v38 = vpop.permute.xlu1 %685 }
  0xab   :  { %1600 = vset.pattern.permute.xlu0 %v1714_v13  ;;  %vm694_vm0 = vcmp.ne.s32.totalorder %v686_v38, 0 }
  0xac   :  { %941 = vperm.xlu0 %1600, %v928_v12   ;;  %vm702_vm15 = vmand %vm662_vm6, %vm694_vm0 }
  0xad   :  { %v821_v57 = vsel %vm702_vm15, 1, %v1712_v3  ;;  %v1137_v3 = vld [vmem:[#allocation2 + $0xb8] sm:$0xff] }
  0xae   :  { %841 = vperm.xlu1 %1597, %v820_v28   ;;  %v1526_v52 = vpack.c.bf16 %v1137_v3, %v1136_v4 }
  0xb0   :  { %947 = vperm.xlu0 %1600, %v930_v11   ;;  %1527 = vmatprep.subr.bf16.mxu1 %v1526_v52 }
  0xb1   :  { %1529 = vmatpush3.bf16.msra.mxu1 %v1528_v17 }
  0xb2   :  { %844 = vperm.xlu1 %1597, %v821_v57   ;;  %1531 = vmatprep.subr.bf16.mxu1 %v1530_v42 }
  0xb4   :  { %953 = vperm.xlu0 %1600, %v932_v26  }
  0xb5   :  { %1533 = vmatpush3.bf16.msra.mxu1 %v1532_v32 }
  0xb6   :  { %1599 = vset.pattern.permute.xlu1 %v1714_v13  ;;  %1535 = vmatprep.subr.bf16.mxu1 %v1534_v21  ;;  %v712_v55 = vpop.permute.xlu0 %711 }
  0xb7   :  { %938 = vperm.xlu1 %1599, %v927_v29   ;;  %vm730_vm14 = vcmp.eq.s32.totalorder %v712_v55, 1 }
  0xb9   :  { %1537 = vmatpush3.bf16.msra.mxu1 %v1536_v24 }
  0xba   :  { %1539 = vmatprep.subr.bf16.mxu1 %v1538_v33  ;;  %v715_v10 = vpop.permute.xlu0 %714 }
  0xbb   :  { %935 = vperm.xlu1 %1599, %v926_v30   ;;  %v709_v12 = vpop.permute.xlu1 %708  ;;  %vm731_vm1 = vcmp.eq.s32.totalorder %v715_v10, 1 }
  0xbc   :  { %vm729_vm2 = vcmp.eq.s32.totalorder %v709_v12, 1 }
  0xbd   :  { %1541 = vmatpush3.bf16.msra.mxu1 %v1540_v53 }
  0xbe   :  { %1543 = vmatprep.subr.bf16.mxu1 %v1542_v20 }
  0xbf   :  { %944 = vperm.xlu1 %1599, %v929_v39   ;;  %v2186_v47 = vpop.permute.xlu0 %717 }
  0xc0   :  { %v706_v13 = vpop.permute.xlu1 %705  ;;  %vm732_vm9 = vcmp.eq.s32.totalorder %v2186_v47, 1 }
  0xc1   :  { %1545 = vmatpush3.bf16.msra.mxu1 %v1544_v51  ;;  %vm728_vm3 = vcmp.eq.s32.totalorder %v706_v13, 1 }
  0xc2   :  { %1546 = vmatprep.subr.bf16.mxu1 %v1715_v54 }
  0xc3   :  { %950 = vperm.xlu1 %1599, %v931_v37   ;;  %v2188_v38 = vpop.permute.xlu0 %720 }
  0xc4   :  { %vm733_vm10 = vcmp.eq.s32.totalorder %v2188_v38, 1 }
  0xc7   :  { %956 = vperm.xlu1 %1599, %v933_v27  }
 0x117   :  { %v824_v28 = vpop.permute.xlu1 %823 }
 0x118   :  { %vm846_vm4 = vcmp.eq.s32.totalorder %v824_v28, 1 }
 0x119   :  { %v827_v11 = vpop.permute.xlu0 %826 }
 0x11a   :  { %vm847_vm6 = vcmp.eq.s32.totalorder %v827_v11, 1 }
 0x11d   :  { %v830_v57 = vpop.permute.xlu1 %829 }
 0x11e   :  { %v833_v26 = vpop.permute.xlu0 %832  ;;  %vm848_vm12 = vcmp.eq.s32.totalorder %v830_v57, 1 }
 0x11f   :  { %vm849_vm7 = vcmp.eq.s32.totalorder %v833_v26, 1 }
 0x121   :  { %v2190_v29 = vpop.f32.mrb[0].mxu0  ;;  %v2200_v56 = vpop.permute.xlu1 %835 }
 0x122   :  { %v738_v30 = vsel %vm730_vm14, %v2190_v29, -1e+30  ;;  %v2193_v39 = vpop.f32.mrb[1].mxu0  ;;  %v856_v37 = vsel %vm848_vm12, %v2190_v29, -1e+30  ;;  %v2206_v61 = vpop.permute.xlu0 %723  ;;  %vm850_vm11 = vcmp.eq.s32.totalorder %v2200_v56, 1 }
 0x123   :  { %v756_v58 = vrot.slane %v738_v30, 4  ;;  %v736_v59 = vsel %vm728_vm3, %v2193_v39, -1e+30  ;;  %v854_v14 = vsel %vm846_vm4, %v2193_v39, -1e+30  ;;  %v2198_v15 = vpop.f32.mrb[2].mxu0 }
 0x124   :  { %v744_v1 = vrot.slane %v736_v59, 4  ;;  %v862_v27 = vrot.slane %v854_v14, 4  ;;  %v739_v19 = vsel %vm731_vm1, %v2198_v15, -1e+30  ;;  %v2204_v49 = vpop.f32.mrb[3].mxu0  ;;  %v874_v34 = vrot.slane %v856_v37, 4 }
 0x125   :  { %v757_v7 = vmax.f32 %v738_v30, %v756_v58  ;;  %v762_v62 = vrot.slane %v739_v19, 4  ;;  %v737_v63 = vsel %vm729_vm2, %v2204_v49, -1e+30  ;;  %v855_v0 = vsel %vm847_vm6, %v2204_v49, -1e+30 }
 0x126   :  { %v745_v2 = vmax.f32 %v736_v59, %v744_v1  ;;  %v863_v50 = vmax.f32 %v854_v14, %v862_v27  ;;  %v750_v5 = vrot.slane %v737_v63, 4  ;;  %v868_v8 = vrot.slane %v855_v0, 4 }
 0x127   :  { %v758_v4 = vrot.slane %v757_v7, 2  ;;  %v763_v3 = vmax.f32 %v739_v19, %v762_v62  ;;  %v857_v52 = vsel %vm849_vm7, %v2198_v15, -1e+30  ;;  %v875_v9 = vmax.f32 %v856_v37, %v874_v34  ;;  %v727_v62 = vpop.permute.xlu0 %726 }
 0x128   :  { %vm734_vm8 = vcmp.eq.s32.totalorder %v2206_v61, 1  ;;  %v746_v16 = vrot.slane %v745_v2, 2  ;;  %v864_v17 = vrot.slane %v863_v50, 2  ;;  %v751_v35 = vmax.f32 %v737_v63, %v750_v5 }
 0x129   :  { %v869_v40 = vmax.f32 %v855_v0, %v868_v8  ;;  %v759_v42 = vmax.f32 %v757_v7, %v758_v4  ;;  %v764_v60 = vrot.slane %v763_v3, 2  ;;  %v880_v23 = vrot.slane %v857_v52, 4  ;;  %v2215_v43 = vpop.f32.mrb[4].mxu0  ;;  %v2220_v25 = vpop.permute.xlu1 %838 }
 0x12a   :  { %v876_v32 = vrot.slane %v875_v9, 2  ;;  %v747_v18 = vmax.f32 %v745_v2, %v746_v16  ;;  %v865_v21 = vmax.f32 %v863_v50, %v864_v17  ;;  %v752_v22 = vrot.slane %v751_v35, 2  ;;  %v2218_v24 = vpop.f32.mrb[5].mxu0 }
 0x12b   :  { %v870_v36 = vrot.slane %v869_v40, 2  ;;  %v760_v31 = vrot.slane %v759_v42, 1  ;;  %v765_v33 = vmax.f32 %v763_v3, %v764_v60  ;;  %v881_v41 = vmax.f32 %v857_v52, %v880_v23  ;;  %v2222_v53 = vpop.f32.mrb[6].mxu0  ;;  %v942_v56 = vpop.permute.xlu0 %941 }
 0x12c   :  { %v877_v44 = vmax.f32 %v875_v9, %v876_v32  ;;  %v748_v46 = vrot.slane %v747_v18, 1  ;;  %v866_v20 = vrot.slane %v865_v21, 1  ;;  %v753_v6 = vmax.f32 %v751_v35, %v752_v22  ;;  %v2229_v51 = vpop.f32.mrb[7].mxu0 }
 0x12d   :  { %v871_v48 = vmax.f32 %v869_v40, %v870_v36  ;;  %v761_v55 = vmax.f32 %v759_v42, %v760_v31  ;;  %v766_v10 = vrot.slane %v765_v33, 1  ;;  %v882_v12 = vrot.slane %v881_v41, 2  ;;  %v842_v30 = vpop.permute.xlu1 %841 }
 0x12e   :  { %v878_v13 = vrot.slane %v877_v44, 1  ;;  %v749_v28 = vmax.f32 %v747_v18, %v748_v46  ;;  %v867_v11 = vmax.f32 %v865_v21, %v866_v20  ;;  %v754_v57 = vrot.slane %v753_v6, 1 }
 0x12f   :  { %v872_v26 = vrot.slane %v871_v48, 1  ;;  %v800_v37 = vadd.f32 %v2227_v45, %v761_v55  ;;  %v767_v58 = vmax.f32 %v765_v33, %v766_v10  ;;  %v883_v59 = vmax.f32 %v881_v41, %v882_v12 }
 0x130   :  { %v879_v14 = vmax.f32 %v877_v44, %v878_v13  ;;  %v755_v1 = vmax.f32 %v753_v6, %v754_v57  ;;  %v798_v19 = vadd.f32 %v2227_v45, %v749_v28  ;;  %v910_v63 = vadd.f32 %v2227_v45, %v867_v11 }
 0x131   :  { %v873_v27 = vmax.f32 %v871_v48, %v872_v26  ;;  %1612 = vtanh.f32 %v800_v37  ;;  %v801_v34 = vadd.f32 %v2227_v45, %v767_v58  ;;  %v884_v7 = vrot.slane %v883_v59, 1  ;;  %v2246_v52 = vpop.permute.xlu1 %844  ;;  %v948_v26 = vpop.permute.xlu0 %947 }
 0x132   :  { %v799_v0 = vadd.f32 %v2227_v45, %v755_v1  ;;  %v742_v50 = vsel %vm734_vm8, %v2215_v43, -1e+30  ;;  %v912_v8 = vadd.f32 %v2227_v45, %v879_v14  ;;  %v740_v3 = vsel %vm732_vm9, %v2218_v24, -1e+30 }
 0x133   :  { %v911_v2 = vadd.f32 %v2227_v45, %v873_v27  ;;  %v885_v5 = vmax.f32 %v883_v59, %v884_v7  ;;  %v780_v4 = vrot.slane %v742_v50, 4  ;;  %1614 = vtanh.f32 %v801_v34 }
 0x134   :  { %v768_v9 = vrot.slane %v740_v3, 4  ;;  %v858_v16 = vsel %vm850_vm11, %v2218_v24, -1e+30  ;;  %v741_v61 = vsel %vm733_vm10, %v2229_v51, -1e+30  ;;  %1616 = vtanh.f32 %v799_v0 }
 0x135   :  { %v913_v17 = vadd.f32 %v2227_v45, %v885_v5  ;;  %v781_v35 = vmax.f32 %v742_v50, %v780_v4  ;;  %v886_v40 = vrot.slane %v858_v16, 4  ;;  %1618 = vtanh.f32 %v911_v2 }
 0x136   :  { %v769_v47 = vmax.f32 %v740_v3, %v768_v9  ;;  %v774_v42 = vrot.slane %v741_v61, 4  ;;  %vm735_vm5 = vcmp.eq.s32.totalorder %v727_v62, 1  ;;  %vm851_vm13 = vcmp.eq.s32.totalorder %v2220_v25, 1  ;;  %v2257_v31 = vpop.permute.xlu1 %938 }
 0x137   :  { %1620 = vtanh.f32 %v913_v17  ;;  %v782_v60 = vrot.slane %v781_v35, 2  ;;  %v887_v23 = vmax.f32 %v858_v16, %v886_v40  ;;  %v743_v32 = vsel %vm735_vm5, %v2222_v53, -1e+30 }
 0x138   :  { %1622 = vtanh.f32 %v912_v8  ;;  %v770_v18 = vrot.slane %v769_v47, 2  ;;  %v775_v21 = vmax.f32 %v741_v61, %v774_v42  ;;  %v786_v38 = vrot.slane %v743_v32, 4 }
 0x139   :  { %v783_v22 = vmax.f32 %v781_v35, %v782_v60  ;;  %v888_v36 = vrot.slane %v887_v23, 2  ;;  %vm852_vm0 = vcmp.eq.s32.totalorder %v842_v30, 1  ;;  %v859_v46 = vsel %vm851_vm13, %v2229_v51, -1e+30  ;;  %v954_v60 = vpop.permute.xlu0 %953 }
 0x13a   :  { %v771_v33 = vmax.f32 %v769_v47, %v770_v18  ;;  %v776_v41 = vrot.slane %v775_v21, 2  ;;  %v787_v44 = vmax.f32 %v743_v32, %v786_v38  ;;  %1624 = vtanh.f32 %v798_v19  ;;  %v936_v62 = vpop.permute.xlu1 %935 }
 0x13b   :  { %v2260_v20 = vpop.eup %1612  ;;  %v784_v6 = vrot.slane %v783_v22, 1  ;;  %v889_v48 = vmax.f32 %v887_v23, %v888_v36  ;;  %v892_v55 = vrot.slane %v859_v46, 4  ;;  %v860_v28 = vsel %vm852_vm0, %v2215_v43, -1e+30 }
 0x13c   :  { %v772_v10 = vrot.slane %v771_v33, 1  ;;  %v777_v12 = vmax.f32 %v775_v21, %v776_v41  ;;  %v788_v13 = vrot.slane %v787_v44, 2  ;;  %1626 = vtanh.f32 %v910_v63 }
 0x13d   :  { %v785_v25 = vmax.f32 %v783_v22, %v784_v6  ;;  %v890_v11 = vrot.slane %v889_v48, 1  ;;  %v893_v57 = vmax.f32 %v859_v46, %v892_v55  ;;  %v2263_v30 = vpop.eup %1614  ;;  %v1049_v37 = vrot.slane %v2260_v20, 6 }
 0x13e   :  { %v773_v58 = vmax.f32 %v771_v33, %v772_v10  ;;  %v778_v59 = vrot.slane %v777_v12, 1  ;;  %v789_v14 = vmax.f32 %v787_v44, %v788_v13  ;;  %v2266_v1 = vpop.eup %1616  ;;  %v898_v7 = vrot.slane %v860_v28, 4  ;;  %v945_v33 = vpop.permute.xlu1 %944 }
 0x13f   :  { %v804_v27 = vadd.f32 %v2227_v45, %v785_v25  ;;  %v891_v19 = vmax.f32 %v889_v48, %v890_v11  ;;  %v894_v34 = vrot.slane %v893_v57, 2  ;;  %v2269_v63 = vpop.eup %1618  ;;  %vm960_vm15 = vcmp.eq.s32.totalorder %v942_v56, 1 }
 0x140   :  { %v802_v0 = vadd.f32 %v2227_v45, %v773_v58  ;;  %v779_v2 = vmax.f32 %v777_v12, %v778_v59  ;;  %v790_v50 = vrot.slane %v789_v14, 1  ;;  %v1052_v8 = vrot.slane %v2263_v30, 5 }
 0x141   :  { %v2272_v5 = vpop.eup %1620  ;;  %1628 = vtanh.f32 %v804_v27  ;;  %v914_v4 = vadd.f32 %v2227_v45, %v891_v19  ;;  %v895_v3 = vmax.f32 %v893_v57, %v894_v34  ;;  %v1046_v16 = vrot.slane %v2266_v1, 7 }
 0x142   :  { %v2276_v9 = vpop.eup %1622  ;;  %v1076_v61 = vrot.slane %v2269_v63, 7  ;;  %v1080_v17 = vrot.slane %v2272_v5, 5  ;;  %1630 = vtanh.f32 %v802_v0  ;;  %v803_v35 = vadd.f32 %v2227_v45, %v779_v2 }
 0x143   :  { %v2282_v40 = vmax.f32 %v789_v14, %v790_v50  ;;  %v896_v47 = vrot.slane %v895_v3, 1  ;;  %v899_v42 = vmax.f32 %v860_v28, %v898_v7  ;;  %v1078_v23 = vrot.slane %v2276_v9, 6  ;;  %v951_v14 = vpop.permute.xlu1 %950 }
 0x144   :  { %1632 = vtanh.f32 %v914_v4  ;;  %v968_v32 = vsel %vm960_vm15, %v2190_v29, -1e+30  ;;  %vm853_vm12 = vcmp.eq.s32.totalorder %v2246_v52, 1  ;;  %v2288_v18 = vpop.eup %1624  ;;  %vm962_vm14 = vcmp.eq.s32.totalorder %v948_v26, 1 }
 0x145   :  { %v897_v21 = vmax.f32 %v895_v3, %v896_v47  ;;  %v900_v38 = vrot.slane %v899_v42, 2  ;;  %v986_v22 = vrot.slane %v968_v32, 4  ;;  %v861_v36 = vsel %vm853_vm12, %v2222_v53, -1e+30 }
 0x146   :  { %v904_v41 = vrot.slane %v861_v36, 4  ;;  %vm964_vm1 = vcmp.eq.s32.totalorder %v954_v60, 1  ;;  %vm959_vm2 = vcmp.eq.s32.totalorder %v2257_v31, 1  ;;  %v2292_v44 = vpop.eup %1626  ;;  %v970_v52 = vsel %vm962_vm14, %v2218_v24, -1e+30 }
 0x147   :  { %v915_v56 = vadd.f32 %v2227_v45, %v897_v21  ;;  %v901_v29 = vmax.f32 %v899_v42, %v900_v38  ;;  %v987_v46 = vmax.f32 %v968_v32, %v986_v22  ;;  %v998_v48 = vrot.slane %v970_v52, 4 }
 0x148   :  { %v905_v6 = vmax.f32 %v861_v36, %v904_v41  ;;  %v972_v55 = vsel %vm964_vm1, %v2215_v43, -1e+30  ;;  %v967_v10 = vsel %vm959_vm2, %v2204_v49, -1e+30  ;;  %vm958_vm3 = vcmp.eq.s32.totalorder %v936_v62, 1  ;;  %v957_v41 = vpop.permute.xlu1 %956 }
 0x149   :  { %1634 = vtanh.f32 %v915_v56  ;;  %v902_v12 = vrot.slane %v901_v29, 1  ;;  %v988_v13 = vrot.slane %v987_v46, 2  ;;  %v1010_v28 = vrot.slane %v972_v55, 4 }
 0x14a   :  { %v906_v25 = vrot.slane %v905_v6, 2  ;;  %v999_v31 = vmax.f32 %v970_v52, %v998_v48  ;;  %v980_v11 = vrot.slane %v967_v10, 4  ;;  %v966_v24 = vsel %vm958_vm3, %v2193_v39, -1e+30 }
 0x14b   :  { %v2298_v57 = vpop.eup %1628  ;;  %v903_v26 = vmax.f32 %v901_v29, %v902_v12  ;;  %v989_v58 = vmax.f32 %v987_v46, %v988_v13  ;;  %v1011_v59 = vmax.f32 %v972_v55, %v1010_v28  ;;  %v974_v34 = vrot.slane %v966_v24, 4 }
 0x14c   :  { %v2301_v27 = vpop.eup %1630  ;;  %v907_v43 = vmax.f32 %v905_v6, %v906_v25  ;;  %v1000_v49 = vrot.slane %v999_v31, 2  ;;  %v981_v19 = vmax.f32 %v967_v10, %v980_v11  ;;  %vm961_vm4 = vcmp.eq.s32.totalorder %v945_v33, 1 }
 0x14d   :  { %v916_v7 = vadd.f32 %v2227_v45, %v903_v26  ;;  %v990_v0 = vrot.slane %v989_v58, 1  ;;  %v1012_v2 = vrot.slane %v1011_v59, 2  ;;  %vm1047_vm6 = vcmask 1041409  }
 0x14e   :  { %v2304_v62 = vpop.eup %1632  ;;  %v908_v50 = vrot.slane %v907_v43, 1  ;;  %v1001_v4 = vmax.f32 %v999_v31, %v1000_v49  ;;  %v982_v3 = vrot.slane %v981_v19, 2  ;;  %v975_v47 = vmax.f32 %v966_v24, %v974_v34 }
 0x14f   :  { %vm1050_vm7 = vcmask 1042434   ;;  %1636 = vtanh.f32 %v916_v7  ;;  %v991_v39 = vmax.f32 %v989_v58, %v990_v0  ;;  %v1013_v42 = vmax.f32 %v1011_v59, %v1012_v2 }
 0x150   :  { %v969_v60 = vsel %vm961_vm4, %v2198_v15, -1e+30  ;;  %vm1053_vm8 = vcmask 1043459   ;;  %1638 = vtanh.f32 %v803_v35  ;;  %v1002_v32 = vrot.slane %v1001_v4, 1 }
 0x151   :  { %v983_v21 = vmax.f32 %v981_v19, %v982_v3  ;;  %v976_v38 = vrot.slane %v975_v47, 2  ;;  %v1024_v22 = vadd.f32 %v2227_v45, %v991_v39  ;;  %v1014_v36 = vrot.slane %v1013_v42, 1 }
 0x152   :  { %v992_v33 = vrot.slane %v969_v60, 4  ;;  %vm963_vm9 = vcmp.eq.s32.totalorder %v951_v14, 1  ;;  %vm1056_vm10 = vcmask 1044484   ;;  %v1003_v56 = vmax.f32 %v1001_v4, %v1002_v32 }
 0x153   :  { %v984_v29 = vrot.slane %v983_v21, 1  ;;  %v977_v46 = vmax.f32 %v975_v47, %v976_v38  ;;  %v971_v52 = vsel %vm963_vm9, %v2229_v51, -1e+30  ;;  %v1635_v6 = vpop.eup %1634  ;;  %v909_v48 = vmax.f32 %v907_v43, %v908_v50 }
 0x154   :  { %v1015_v15 = vmax.f32 %v1013_v42, %v1014_v36  ;;  %v993_v55 = vmax.f32 %v969_v60, %v992_v33  ;;  %v1004_v35 = vrot.slane %v971_v52, 4  ;;  %v805_v10 = vadd.f32 %v2227_v45, %v2282_v40 }
 0x155   :  { %v985_v12 = vmax.f32 %v983_v21, %v984_v29  ;;  %v978_v13 = vrot.slane %v977_v46, 1  ;;  %vm965_vm11 = vcmp.eq.s32.totalorder %v957_v41, 1  ;;  %vm1059_vm5 = vcmask 1045509  }
 0x156   :  { %1640 = vtanh.f32 %v1024_v22  ;;  %v994_v28 = vrot.slane %v993_v55, 2  ;;  %v1005_v25 = vmax.f32 %v971_v52, %v1004_v35  ;;  %v973_v31 = vsel %vm965_vm11, %v2222_v53, -1e+30  ;;  %v1146_v52 = vld [vmem:[#allocation2 + $0x100] sm:$0xff] }
 0x157   :  { %vm1062_vm13 = vcmask 1046534   ;;  %v1026_v51 = vadd.f32 %v2227_v45, %v1003_v56  ;;  %v1023_v11 = vadd.f32 %v2227_v45, %v985_v12  ;;  %v979_v26 = vmax.f32 %v977_v46, %v978_v13  ;;  %v1148_v12 = vld [vmem:[#allocation2 + $0x110] sm:$0xff]  ;;  %v1149_v13 = vld [vmem:[#allocation2 + $0x118] sm:$0xff] }
 0x158   :  { %v1016_v58 = vrot.slane %v973_v31, 4  ;;  %v1028_v59 = vadd.f32 %v2227_v45, %v1015_v15  ;;  %v995_v24 = vmax.f32 %v993_v55, %v994_v28  ;;  %v1006_v40 = vrot.slane %v1005_v25, 2 }
 0x159   :  { %v917_v14 = vadd.f32 %v2227_v45, %v909_v48  ;;  %1642 = vtanh.f32 %v1023_v11  ;;  %v1022_v43 = vadd.f32 %v2227_v45, %v979_v26  ;;  %v1077_v53 = vsel %vm1047_vm6, %v1076_v61, %v2292_v44  ;;  %v1637_v19 = vpop.eup %1636 }
 0x15a   :  { %v1017_v49 = vmax.f32 %v973_v31, %v1016_v58  ;;  %v996_v34 = vrot.slane %v995_v24, 1  ;;  %v1007_v7 = vmax.f32 %v1005_v25, %v1006_v40  ;;  %v1079_v0 = vsel %vm1050_vm7, %v1078_v23, %v1077_v53  ;;  %v1639_v2 = vpop.eup %1638  ;;  %v1150_v40 = vld [vmem:[#allocation2 + $0x120] sm:$0xff] }
 0x15b   :  { %1644 = vtanh.f32 %v917_v14  ;;  %v1081_v4 = vsel %vm1053_vm8, %v1080_v17, %v1079_v0  ;;  %v1082_v3 = vrot.slane %v2304_v62, 4  ;;  %v1084_v61 = vrot.slane %v1635_v6, 3  ;;  %v1147_v6 = vld [vmem:[#allocation2 + $0x108] sm:$0xff] }
 0x15c   :  { %1646 = vtanh.f32 %v1022_v43  ;;  %v1018_v50 = vrot.slane %v1017_v49, 2  ;;  %v997_v63 = vmax.f32 %v995_v24, %v996_v34  ;;  %v1008_v47 = vrot.slane %v1007_v7, 1  ;;  %v1151_v14 = vld [vmem:[#allocation2 + $0x128] sm:$0xff] }
 0x15d   :  { %v1086_v44 = vrot.slane %v1637_v19, 2  ;;  %v1083_v42 = vsel %vm1056_vm10, %v1082_v3, %v1081_v4  ;;  %1648 = vtanh.f32 %v805_v10  ;;  %v1048_v9 = vsel %vm1047_vm6, %v1046_v16, %v2288_v18  ;;  %v1153_v4 = vld [vmem:[#allocation2 + $0x138] sm:$0xff] }
 0x15e   :  { %v1019_v39 = vmax.f32 %v1017_v49, %v1018_v50  ;;  %v1025_v23 = vadd.f32 %v2227_v45, %v997_v63  ;;  %v1009_v5 = vmax.f32 %v1007_v7, %v1008_v47  ;;  %v1085_v17 = vsel %vm1059_vm5, %v1084_v61, %v1083_v42  ;;  %v1152_v50 = vld [vmem:[#allocation2 + $0x130] sm:$0xff]  ;;  %v1154_v47 = vld [vmem:[#allocation2 + $0x140] sm:$0xff]  ;;  %v1155_v61 = vld [vmem:[#allocation2 + $0x148] sm:$0xff] }
 0x15f   :  { %v1051_v62 = vsel %vm1050_vm7, %v1049_v37, %v1048_v9  ;;  %1650 = vtanh.f32 %v1026_v51  ;;  %v1087_v32 = vsel %vm1062_vm13, %v1086_v44, %v1085_v17  ;;  %v1055_v18 = vrot.slane %v2301_v27, 4  ;;  %v1157_v42 = vld [vmem:[#allocation2 + $0x158] sm:$0xff] }
 0x160   :  { %v1020_v60 = vrot.slane %v1019_v39, 1  ;;  %v1054_v21 = vsel %vm1053_vm8, %v1052_v8, %v1051_v62  ;;  %v1641_v1 = vpop.eup %1640  ;;  %1652 = vtanh.f32 %v1025_v23  ;;  %v1027_v16 = vadd.f32 %v2227_v45, %v1009_v5  ;;  %v1158_v23 = vld [vmem:[#allocation2 + $0x160] sm:$0xff]  ;;  %v1159_v5 = vld [vmem:[#allocation2 + $0x168] sm:$0xff]  ;;  %v1160_v62 = vld [vmem:[#allocation2 + $0x170] sm:$0xff] }
 0x161   :  { %v1058_v38 = vrot.slane %v1639_v2, 3  ;;  %1654 = vtanh.f32 %v1028_v59  ;;  %v1057_v20 = vsel %vm1056_vm10, %v1055_v18, %v1054_v21  ;;  %v1061_v37 = vrot.slane %v2298_v57, 2  ;;  %v1372_v18 = vld [vmem:[%s2385_s5] ss:$0 sm:$0xff] }
 0x162   :  { %v1021_v22 = vmax.f32 %v1019_v39, %v1020_v60  ;;  %1656 = vtanh.f32 %v1027_v16  ;;  %v1101_v46 = vrot.slane %v1641_v1, 6  ;;  %vm1065_vm0 = vcmask 1047559   ;;  %v1156_v39 = vld [vmem:[#allocation2 + $0x150] sm:$0xff]  ;;  %v1161_v60 = vld [vmem:[#allocation2 + $0x178] sm:$0xff] }
 0x163   :  { %v1643_v36 = vpop.eup %1642  ;;  %v1060_v30 = vsel %vm1059_vm5, %v1058_v38, %v1057_v20  ;;  %v1547_v35 = vpack.c.bf16 %v1147_v6, %v1146_v52  ;;  %v1550_v58 = vpack.c.bf16 %v1149_v13, %v1148_v12  ;;  %vm1716_vm15 = vmmov 0  }
 0x164   :  { %v1029_v33 = vadd.f32 %v2227_v45, %v1021_v22  ;;  %v1099_v41 = vrot.slane %v1643_v36, 7  ;;  %v1063_v56 = vsel %vm1062_vm13, %v1061_v37, %v1060_v30  ;;  %v1717_v59 = vmov 0.0  }
 0x165   :  { %v1645_v8 = vpop.eup %1644  ;;  %v1553_v7 = vpack.c.bf16 %v1151_v14, %v1150_v40  ;;  %v1556_v63 = vpack.c.bf16 %v1153_v4, %v1152_v50  ;;  %v1559_v44 = vpack.c.bf16 %v1155_v61, %v1154_v47  ;;  %v1562_v9 = vpack.c.bf16 %v1157_v42, %v1156_v39 }
 0x166   :  { %v1647_v29 = vpop.eup %1646  ;;  %1658 = vtanh.f32 %v1029_v33  ;;  %v1088_v27 = vrot.slane %v1645_v8, 1  ;;  %v1565_v17 = vpack.c.bf16 %v1159_v5, %v1158_v23 }
 0x167   :  { %v1100_v48 = vsel %vm1047_vm6, %v1099_v41, %v1647_v29  ;;  %v1649_v15 = vpop.eup %1648 }
 0x168   :  { %v1089_v57 = vsel %vm1065_vm0, %v1088_v27, %v1087_v32  ;;  %v1102_v45 = vsel %vm1050_vm7, %v1101_v46, %v1100_v48  ;;  %v1064_v55 = vrot.slane %v1649_v15, 1  ;;  %v1568_v32 = vpack.c.bf16 %v1161_v60, %v1160_v62 }
 0x169   :  { %1233 = vmatprep.mubr.f32.mxu1 %v1089_v57  ;;  %v1651_v10 = vpop.eup %1650 }
 0x16a   :  { %v1653_v28 = vpop.eup %1652  ;;  %v1066_v25 = vsel %vm1065_vm0, %v1064_v55, %v1063_v56  ;;  %v1105_v26 = vrot.slane %v1651_v10, 4 }
 0x16b   :  { %v1655_v31 = vpop.eup %1654  ;;  %v1103_v51 = vrot.slane %v1653_v28, 5  ;;  %1234 = vmatmul.mubr.f32.vlgmr.msra.gmra.mrb[0].mxu1 %v1066_v25 }
 0x16c   :  { %v1657_v11 = vpop.eup %1656  ;;  %1548 = vmatpush3.bf16.msra.mxu1 %v1547_v35  ;;  %1511 = vmatprep.mubr.msk.f32.mxu1 %vm1716_vm15, %v1717_v59  ;;  %v1109_v53 = vrot.slane %v1655_v31, 2 }
 0x16d   :  { %v1107_v24 = vrot.slane %v1657_v11, 3  ;;  %1549 = vmatprep.subr.bf16.mxu1 %v1715_v54  ;;  %v1104_v43 = vsel %vm1053_vm8, %v1103_v51, %v1102_v45 }
 0x16e   :  { %v1106_v49 = vsel %vm1056_vm10, %v1105_v26, %v1104_v43 }
 0x16f   :  { %v1108_v34 = vsel %vm1059_vm5, %v1107_v24, %v1106_v49 }
 0x170   :  { %v1659_v19 = vpop.eup %1658  ;;  %1551 = vmatpush3.bf16.msra.mxu1 %v1550_v58  ;;  %v1110_v0 = vsel %vm1062_vm13, %v1109_v53, %v1108_v34 }
 0x171   :  { %v1111_v2 = vrot.slane %v1659_v19, 1  ;;  %1552 = vmatprep.subr.bf16.mxu1 %v1715_v54 }
 0x173   :  { %v1112_v3 = vsel %vm1065_vm0, %v1111_v2, %v1110_v0 }
 0x174   :  { %1554 = vmatpush3.bf16.msra.mxu1 %v1553_v7 }
 0x175   :  { %1555 = vmatprep.subr.bf16.mxu1 %v1715_v54 }
 0x178   :  { %1557 = vmatpush3.bf16.msra.mxu1 %v1556_v63 }
 0x179   :  { %1558 = vmatprep.subr.bf16.mxu1 %v1715_v54 }
 0x17c   :  { %1560 = vmatpush3.bf16.msra.mxu1 %v1559_v44 }
 0x17d   :  { %1561 = vmatprep.subr.bf16.mxu1 %v1715_v54 }
 0x180   :  { %1563 = vmatpush3.bf16.msra.mxu1 %v1562_v9 }
 0x181   :  { %1564 = vmatprep.subr.bf16.mxu1 %v1715_v54 }
 0x184   :  { %1566 = vmatpush3.bf16.msra.mxu1 %v1565_v17 }
 0x185   :  { %1567 = vmatprep.subr.bf16.mxu1 %v1715_v54 }
 0x188   :  { %1569 = vmatpush3.bf16.msra.mxu1 %v1568_v32 }
 0x18b   :  { %1512 = vmatmul.mubr.f32.vlgmr.msra.gmra.mrb[2].mxu1 %v1112_v3 }
 0x23e   :  { %v1423_v21 = vpop.f32.mrb[0].mxu1 }
 0x23f   :  { %v1424_v1 = vpop.f32.mrb[1].mxu1 }
 0x240   :  { %v1425_v16 = vadd.f32 %v1424_v1, %v1423_v21 }
 0x242   :  { %v1236_v38 = vadd.f32 %v1425_v16, %v1372_v18 }
 0x25e   :  { %v1305_v22 = vpop.f32.mrb[2].mxu1 }
 0x25f   :  { %v1306_v20 = vadd.f32 %v1305_v22, %v1236_v38  ;;  %v1513_v37 = vpop.f32.mrb[3].mxu1 }
 0x261   :  { %1309 = vst [vmem:[#allocation5] sm:$0xff] %v1306_v20 }
 0x262   :  { %1693 = shalt.err (!%p1690_p12)
}
 0x263   :  { %s1694_s26 = scalar_lea.hbm %s2386_s6, 128 }
 0x264   :  { %p1695_p13 = scmp.ne.s32.totalorder %s2386_s6, %s1694_s26  ;;  %p1698_p0 = scmp.lt.u32.totalorder %s1694_s26, %s2386_s6 }
 0x266   :  { %p1700_p1 = pnand %p1698_p0, %p1695_p13 }
 0x268   :  { %1703 = shalt.err (!%p1700_p1)
}
 0x269   :  { %1319 = dma.vmem_to_hbm [thread:$0]  %s1317_s22, 128, %s2386_s6, [#allocation4]  }
 0x26a   :  { %1706 = dma.done.wait [#allocation4], 128  }
 0x26b   :  { %1707 = vsyncadd [#allocation4], 4294967168 }
 0x26c   :  { %1323 = vsyncpa [#allocation3], 1 }
 0x26d   :  { %1324 = vsyncpa [#allocation4], 1 }

</bundles_post_ra>
